<compile_context>
chip_gen: v6e
topology: v6e:2x2x1
jax: 0.10.0
libtpu: 0.0.40
codegen_flags: <defaults>
</compile_context>

<pallas_src>
import functools

import jax
import jax.numpy as jnp
from jax.experimental import pallas as pl
from jax.experimental.pallas import tpu as pltpu

GRID_SIZE = 5                 # grid_size=5 (odd, unchanged by the %2 adjustment)
SPLINE_LO, SPLINE_HI = -1.0, 1.0


def _round_up(a, m):
    return ((a + m - 1) // m) * m


def _cdiv(a, b):
    return -(-a // b)


# ------------------------------- fused kernel --------------------------------

def _replicate_rows(a, fout):
    """Row o of the result is row (o % fin) of `a`.

    Sublane-friendly replication: broadcast_to + reshape for the whole copies
    (straight sublane copies, no (B, O) HBM gather), plus a remainder slice.
    """
    fin, tb = a.shape
    reps, rem = divmod(fout, fin)
    if reps == 1 and rem == 0:
        return a
    parts = []
    if reps:
        parts.append(
            jnp.broadcast_to(a[None, :, :], (reps, fin, tb)).reshape(reps * fin, tb))
    if rem:
        parts.append(a[:rem, :])
    return parts[0] if len(parts) == 1 else jnp.concatenate(parts, axis=0)


def _make_kan_kernel(layer_dims, grid_size):
    """Builds the fused multi-layer KAN kernel.

    Kernel refs:
      x_ref:           (F0, TB)      input batch tile, batch on lanes
      tab_ref[l]:      (O_l, G + 3)  per-edge params: [:, :G] = spline control
                       points, [:, G] = w_silu, [:, G+1] = w_spline, [:, G+2] = bias
      o_ref:           (O_last, TB)  output batch tile
    """
    n_layers = len(layer_dims)
    inv_h = float(grid_size - 1) / (SPLINE_HI - SPLINE_LO)

    def kernel(x_ref, *refs):
        o_ref = refs[n_layers]
        a = x_ref[...].astype(jnp.float32)                     # (F0, TB)

        for l, (fin, fout) in enumerate(layer_dims):
            tab = refs[l][...].astype(jnp.float32)             # (fout, G+3)

            # EUP-heavy SiLU (tanh form -> EUP slot) and the spline index math on
            # the narrow (fin, TB) activation, BEFORE the o % fin replication.
            silu_n = a * (0.5 * jnp.tanh(0.5 * a) + 0.5)       # SiLU(x) = x*sigmoid(x)
            t_n = (jnp.clip(a, SPLINE_LO, SPLINE_HI) - SPLINE_LO) * inv_h

            # In-kernel gather: output row o reads input row (o % fin).
            silu = _replicate_rows(silu_n, fout)               # (fout, TB)
            t = _replicate_rows(t_n, fout)                     # (fout, TB)

            # Linear (degree-1) B-spline branch: hat-basis expansion over a uniform
            # grid, clamped outside [SPLINE_LO, SPLINE_HI].  t in [0, G-1], G static.
            spline = jnp.zeros_like(t)
            for k in range(grid_size):
                hat = jnp.maximum(0.0, 1.0 - jnp.abs(t - float(k)))
                spline = spline + hat * tab[:, k:k + 1]        # lane broadcast

            a = (tab[:, grid_size:grid_size + 1] * silu
                 + tab[:, grid_size + 1:grid_size + 2] * spline
                 + tab[:, grid_size + 2:grid_size + 3])

        o_ref[...] = a.astype(o_ref.dtype)

    return kernel


def kan_forward(x, tabs, *, tile_b=1024):
    """Fused KAN forward.  x: (B, in_features) -> (B, out_features).

    `tabs` is a list of per-layer packed parameter tables of shape
    (out_features_l, GRID_SIZE + 3).  Layer widths are derived from the static
    array shapes (never from traced values), so this traces cleanly under jit.
    """
    b, f0 = x.shape

    layer_dims = []
    fin = f0
    for tab in tabs:
        fout = int(tab.shape[0])
        layer_dims.append((fin, fout))
        fin = fout
    layer_dims = tuple(layer_dims)
    out_f = layer_dims[-1][1]

    # --- batch tiling: large, lane-aligned tiles; even step count (>= 2 when the
    # batch allows) so the "parallel" axis feeds both v7x TensorCores.
    bp = _round_up(b, 128)
    tb = min(_round_up(tile_b, 128), bp)
    n_steps = _cdiv(bp, tb)
    if n_steps == 1 and bp >= 256:
        n_steps = 2
    if n_steps > 1 and n_steps % 2 == 1:
        n_steps += 1
    tb = _round_up(_cdiv(bp, n_steps), 128)
    bp = n_steps * tb

    # Batch on the lane axis: transpose once at entry / exit instead of per layer.
    xt = jnp.transpose(x)                                       # (F0, B)
    if bp != b:                                                 # pad only when needed
        xt = jnp.pad(xt, ((0, 0), (0, bp - b)))

    kernel = _make_kan_kernel(layer_dims, GRID_SIZE)

    in_specs = [pl.BlockSpec((f0, tb), lambda i: (0, i))]
    for (_, fout) in layer_dims:
        # Params resident across batch tiles (constant block index -> no re-DMA).
        in_specs.append(
            pl.BlockSpec((fout, GRID_SIZE + 3), lambda i: (0, 0)))

    out_t = pl.pallas_call(
        kernel,
        out_shape=jax.ShapeDtypeStruct((out_f, bp), x.dtype),
        grid=(n_steps,),
        in_specs=in_specs,
        out_specs=pl.BlockSpec((out_f, tb), lambda i: (0, i)),
        compiler_params=pltpu.CompilerParams(
            dimension_semantics=("parallel",)),
    )(xt, *tabs)

    y_t = out_t if bp == b else out_t[:, :b]
    return jnp.transpose(y_t)                                   # (B, out_features)


# ----------------------- deterministic parameter setup -----------------------

def init_kan_params(key, in_features, out_features, hidden_states,
                    grid_size=GRID_SIZE):
    """One packed table per layer: (O, G+3) = [spline coefs | w_silu | w_spline | bias]."""
    dims = [in_features] + list(hidden_states) + [out_features]
    tabs = []
    for i in range(len(dims) - 1):
        key, sub = jax.random.split(key)
        tabs.append(0.5 * jax.random.normal(sub, (dims[i + 1], grid_size + 3),
                                            jnp.float32))
    return tabs


# ------------------------------ pure-JAX reference ---------------------------

def kan_layer_ref(x, tab, in_features, out_features):
    idx = jnp.arange(out_features) % in_features
    u = x[:, idx]                                               # (B, O)
    silu = u * (0.5 * jnp.tanh(0.5 * u) + 0.5)
    inv_h = (GRID_SIZE - 1) / (SPLINE_HI - SPLINE_LO)
    t = (jnp.clip(u, SPLINE_LO, SPLINE_HI) - SPLINE_LO) * inv_h
    spline = jnp.zeros_like(u)
    for k in range(GRID_SIZE):
        spline = spline + jnp.maximum(0.0, 1.0 - jnp.abs(t - k)) * tab[None, :, k]
    return (tab[None, :, GRID_SIZE] * silu
            + tab[None, :, GRID_SIZE + 1] * spline
            + tab[None, :, GRID_SIZE + 2])


if __name__ == "__main__":
    key = jax.random.PRNGKey(0)
    batch, in_features, hidden_states, out_features = 256, 4, [16, 8], 4

    kx, kp = jax.random.split(key)
    x = jax.random.normal(kx, (batch, in_features), jnp.float32)
    tabs = init_kan_params(kp, in_features, out_features, hidden_states)

    fwd = jax.jit(functools.partial(kan_forward, tile_b=1024))
    y = jax.block_until_ready(fwd(x, tabs))

    # cross-check against the pure-JAX reference
    y_ref = x
    fin = in_features
    for tab in tabs:
        fout = int(tab.shape[0])
        y_ref = kan_layer_ref(y_ref, tab, fin, fout)
        fin = fout

    assert y.shape == (batch, out_features)
    err = float(jnp.max(jnp.abs(y - y_ref)))
    assert jnp.allclose(y, y_ref, atol=1e-4, rtol=1e-4), err
    print("KERNEL_OK")
</pallas_src>

<mosaic_0001>
module attributes {stable_mosaic.version = 11 : i64} {
  func.func @kernel(%arg0: i32, %arg1: memref<4x128xf32, #tpu.memory_space<vmem>>, %arg2: memref<16x8xf32, #tpu.memory_space<vmem>>, %arg3: memref<8x8xf32, #tpu.memory_space<vmem>>, %arg4: memref<4x8xf32, #tpu.memory_space<vmem>>, %arg5: memref<4x128xf32, #tpu.memory_space<vmem>>) attributes {dimension_semantics = [#tpu.dimension_semantics<parallel>], iteration_bounds = array<i64: 2>, scalar_prefetch = 0 : i64, scratch_operands = 0 : i64, tpu.core_type = #tpu.core_type<tc>, window_params = [{transform_indices = @transform_0, window_bounds = array<i64: 4, 128>}, {pipeline_mode = #tpu.pipeline_mode<synchronous>, transform_indices = @transform_1, window_bounds = array<i64: 16, 8>}, {pipeline_mode = #tpu.pipeline_mode<synchronous>, transform_indices = @transform_2, window_bounds = array<i64: 8, 8>}, {pipeline_mode = #tpu.pipeline_mode<synchronous>, transform_indices = @transform_3, window_bounds = array<i64: 4, 8>}, {transform_indices = @transform_4, window_bounds = array<i64: 4, 128>}]} {
    %c0 = arith.constant 0 : index
    %c0_0 = arith.constant 0 : index
    %0 = vector.load %arg1[%c0, %c0_0] : memref<4x128xf32, #tpu.memory_space<vmem>>, vector<4x128xf32>
    %c0_1 = arith.constant 0 : index
    %c0_2 = arith.constant 0 : index
    %1 = vector.load %arg2[%c0_1, %c0_2] : memref<16x8xf32, #tpu.memory_space<vmem>>, vector<16x8xf32>
    %cst = arith.constant 5.000000e-01 : f32
    %2 = vector.broadcast %cst : f32 to vector<4x128xf32>
    %3 = arith.mulf %2, %0 : vector<4x128xf32>
    %4 = math.tanh %3 : vector<4x128xf32>
    %cst_3 = arith.constant 5.000000e-01 : f32
    %5 = vector.broadcast %cst_3 : f32 to vector<4x128xf32>
    %6 = arith.mulf %5, %4 : vector<4x128xf32>
    %cst_4 = arith.constant 5.000000e-01 : f32
    %7 = vector.broadcast %cst_4 : f32 to vector<4x128xf32>
    %8 = arith.addf %6, %7 : vector<4x128xf32>
    %9 = arith.mulf %0, %8 : vector<4x128xf32>
    %cst_5 = arith.constant -1.000000e+00 : f32
    %cst_6 = arith.constant 1.000000e+00 : f32
    %10 = vector.broadcast %cst_5 : f32 to vector<4x128xf32>
    %11 = arith.maximumf %10, %0 : vector<4x128xf32>
    %12 = vector.broadcast %cst_6 : f32 to vector<4x128xf32>
    %13 = arith.minimumf %12, %11 : vector<4x128xf32>
    %cst_7 = arith.constant -1.000000e+00 : f32
    %14 = vector.broadcast %cst_7 : f32 to vector<4x128xf32>
    %15 = arith.subf %13, %14 : vector<4x128xf32>
    %cst_8 = arith.constant 2.000000e+00 : f32
    %16 = vector.broadcast %cst_8 : f32 to vector<4x128xf32>
    %17 = arith.mulf %15, %16 : vector<4x128xf32>
    %18 = vector.shape_cast %9 : vector<4x128xf32> to vector<1x4x128xf32>
    %19 = vector.shape_cast %18 : vector<1x4x128xf32> to vector<1x4x128xf32>
    %20 = vector.broadcast %19 : vector<1x4x128xf32> to vector<4x4x128xf32>
    %21 = vector.shape_cast %20 : vector<4x4x128xf32> to vector<16x128xf32>
    %22 = vector.shape_cast %17 : vector<4x128xf32> to vector<1x4x128xf32>
    %23 = vector.shape_cast %22 : vector<1x4x128xf32> to vector<1x4x128xf32>
    %24 = vector.broadcast %23 : vector<1x4x128xf32> to vector<4x4x128xf32>
    %25 = vector.shape_cast %24 : vector<4x4x128xf32> to vector<16x128xf32>
    %cst_9 = arith.constant 0.000000e+00 : f32
    %26 = vector.broadcast %cst_9 : f32 to vector<16x128xf32>
    %cst_10 = arith.constant 0.000000e+00 : f32
    %27 = vector.broadcast %cst_10 : f32 to vector<16x128xf32>
    %28 = arith.subf %25, %27 : vector<16x128xf32>
    %29 = math.absf %28 : vector<16x128xf32>
    %cst_11 = arith.constant 1.000000e+00 : f32
    %30 = vector.broadcast %cst_11 : f32 to vector<16x128xf32>
    %31 = arith.subf %30, %29 : vector<16x128xf32>
    %cst_12 = arith.constant 0.000000e+00 : f32
    %32 = vector.broadcast %cst_12 : f32 to vector<16x128xf32>
    %33 = arith.maximumf %32, %31 : vector<16x128xf32>
    %34 = vector.extract_strided_slice %1 {offsets = [0, 0], sizes = [16, 1], strides = [1, 1]} : vector<16x8xf32> to vector<16x1xf32>
    %35 = vector.broadcast %34 : vector<16x1xf32> to vector<16x128xf32>
    %36 = arith.mulf %33, %35 : vector<16x128xf32>
    %37 = arith.addf %26, %36 : vector<16x128xf32>
    %cst_13 = arith.constant 1.000000e+00 : f32
    %38 = vector.broadcast %cst_13 : f32 to vector<16x128xf32>
    %39 = arith.subf %25, %38 : vector<16x128xf32>
    %40 = math.absf %39 : vector<16x128xf32>
    %cst_14 = arith.constant 1.000000e+00 : f32
    %41 = vector.broadcast %cst_14 : f32 to vector<16x128xf32>
    %42 = arith.subf %41, %40 : vector<16x128xf32>
    %cst_15 = arith.constant 0.000000e+00 : f32
    %43 = vector.broadcast %cst_15 : f32 to vector<16x128xf32>
    %44 = arith.maximumf %43, %42 : vector<16x128xf32>
    %45 = vector.extract_strided_slice %1 {offsets = [0, 1], sizes = [16, 1], strides = [1, 1]} : vector<16x8xf32> to vector<16x1xf32>
    %46 = vector.broadcast %45 : vector<16x1xf32> to vector<16x128xf32>
    %47 = arith.mulf %44, %46 : vector<16x128xf32>
    %48 = arith.addf %37, %47 : vector<16x128xf32>
    %cst_16 = arith.constant 2.000000e+00 : f32
    %49 = vector.broadcast %cst_16 : f32 to vector<16x128xf32>
    %50 = arith.subf %25, %49 : vector<16x128xf32>
    %51 = math.absf %50 : vector<16x128xf32>
    %cst_17 = arith.constant 1.000000e+00 : f32
    %52 = vector.broadcast %cst_17 : f32 to vector<16x128xf32>
    %53 = arith.subf %52, %51 : vector<16x128xf32>
    %cst_18 = arith.constant 0.000000e+00 : f32
    %54 = vector.broadcast %cst_18 : f32 to vector<16x128xf32>
    %55 = arith.maximumf %54, %53 : vector<16x128xf32>
    %56 = vector.extract_strided_slice %1 {offsets = [0, 2], sizes = [16, 1], strides = [1, 1]} : vector<16x8xf32> to vector<16x1xf32>
    %57 = vector.broadcast %56 : vector<16x1xf32> to vector<16x128xf32>
    %58 = arith.mulf %55, %57 : vector<16x128xf32>
    %59 = arith.addf %48, %58 : vector<16x128xf32>
    %cst_19 = arith.constant 3.000000e+00 : f32
    %60 = vector.broadcast %cst_19 : f32 to vector<16x128xf32>
    %61 = arith.subf %25, %60 : vector<16x128xf32>
    %62 = math.absf %61 : vector<16x128xf32>
    %cst_20 = arith.constant 1.000000e+00 : f32
    %63 = vector.broadcast %cst_20 : f32 to vector<16x128xf32>
    %64 = arith.subf %63, %62 : vector<16x128xf32>
    %cst_21 = arith.constant 0.000000e+00 : f32
    %65 = vector.broadcast %cst_21 : f32 to vector<16x128xf32>
    %66 = arith.maximumf %65, %64 : vector<16x128xf32>
    %67 = vector.extract_strided_slice %1 {offsets = [0, 3], sizes = [16, 1], strides = [1, 1]} : vector<16x8xf32> to vector<16x1xf32>
    %68 = vector.broadcast %67 : vector<16x1xf32> to vector<16x128xf32>
    %69 = arith.mulf %66, %68 : vector<16x128xf32>
    %70 = arith.addf %59, %69 : vector<16x128xf32>
    %cst_22 = arith.constant 4.000000e+00 : f32
    %71 = vector.broadcast %cst_22 : f32 to vector<16x128xf32>
    %72 = arith.subf %25, %71 : vector<16x128xf32>
    %73 = math.absf %72 : vector<16x128xf32>
    %cst_23 = arith.constant 1.000000e+00 : f32
    %74 = vector.broadcast %cst_23 : f32 to vector<16x128xf32>
    %75 = arith.subf %74, %73 : vector<16x128xf32>
    %cst_24 = arith.constant 0.000000e+00 : f32
    %76 = vector.broadcast %cst_24 : f32 to vector<16x128xf32>
    %77 = arith.maximumf %76, %75 : vector<16x128xf32>
    %78 = vector.extract_strided_slice %1 {offsets = [0, 4], sizes = [16, 1], strides = [1, 1]} : vector<16x8xf32> to vector<16x1xf32>
    %79 = vector.broadcast %78 : vector<16x1xf32> to vector<16x128xf32>
    %80 = arith.mulf %77, %79 : vector<16x128xf32>
    %81 = arith.addf %70, %80 : vector<16x128xf32>
    %82 = vector.extract_strided_slice %1 {offsets = [0, 5], sizes = [16, 1], strides = [1, 1]} : vector<16x8xf32> to vector<16x1xf32>
    %83 = vector.broadcast %82 : vector<16x1xf32> to vector<16x128xf32>
    %84 = arith.mulf %83, %21 : vector<16x128xf32>
    %85 = vector.extract_strided_slice %1 {offsets = [0, 6], sizes = [16, 1], strides = [1, 1]} : vector<16x8xf32> to vector<16x1xf32>
    %86 = vector.broadcast %85 : vector<16x1xf32> to vector<16x128xf32>
    %87 = arith.mulf %86, %81 : vector<16x128xf32>
    %88 = arith.addf %84, %87 : vector<16x128xf32>
    %89 = vector.extract_strided_slice %1 {offsets = [0, 7], sizes = [16, 1], strides = [1, 1]} : vector<16x8xf32> to vector<16x1xf32>
    %90 = vector.broadcast %89 : vector<16x1xf32> to vector<16x128xf32>
    %91 = arith.addf %88, %90 : vector<16x128xf32>
    %c0_25 = arith.constant 0 : index
    %c0_26 = arith.constant 0 : index
    %92 = vector.load %arg3[%c0_25, %c0_26] : memref<8x8xf32, #tpu.memory_space<vmem>>, vector<8x8xf32>
    %cst_27 = arith.constant 5.000000e-01 : f32
    %93 = vector.broadcast %cst_27 : f32 to vector<16x128xf32>
    %94 = arith.mulf %93, %91 : vector<16x128xf32>
    %95 = math.tanh %94 : vector<16x128xf32>
    %cst_28 = arith.constant 5.000000e-01 : f32
    %96 = vector.broadcast %cst_28 : f32 to vector<16x128xf32>
    %97 = arith.mulf %96, %95 : vector<16x128xf32>
    %cst_29 = arith.constant 5.000000e-01 : f32
    %98 = vector.broadcast %cst_29 : f32 to vector<16x128xf32>
    %99 = arith.addf %97, %98 : vector<16x128xf32>
    %100 = arith.mulf %91, %99 : vector<16x128xf32>
    %cst_30 = arith.constant -1.000000e+00 : f32
    %cst_31 = arith.constant 1.000000e+00 : f32
    %101 = vector.broadcast %cst_30 : f32 to vector<16x128xf32>
    %102 = arith.maximumf %101, %91 : vector<16x128xf32>
    %103 = vector.broadcast %cst_31 : f32 to vector<16x128xf32>
    %104 = arith.minimumf %103, %102 : vector<16x128xf32>
    %cst_32 = arith.constant -1.000000e+00 : f32
    %105 = vector.broadcast %cst_32 : f32 to vector<16x128xf32>
    %106 = arith.subf %104, %105 : vector<16x128xf32>
    %cst_33 = arith.constant 2.000000e+00 : f32
    %107 = vector.broadcast %cst_33 : f32 to vector<16x128xf32>
    %108 = arith.mulf %106, %107 : vector<16x128xf32>
    %109 = vector.extract_strided_slice %100 {offsets = [0, 0], sizes = [8, 128], strides = [1, 1]} : vector<16x128xf32> to vector<8x128xf32>
    %110 = vector.extract_strided_slice %108 {offsets = [0, 0], sizes = [8, 128], strides = [1, 1]} : vector<16x128xf32> to vector<8x128xf32>
    %cst_34 = arith.constant 0.000000e+00 : f32
    %111 = vector.broadcast %cst_34 : f32 to vector<8x128xf32>
    %cst_35 = arith.constant 0.000000e+00 : f32
    %112 = vector.broadcast %cst_35 : f32 to vector<8x128xf32>
    %113 = arith.subf %110, %112 : vector<8x128xf32>
    %114 = math.absf %113 : vector<8x128xf32>
    %cst_36 = arith.constant 1.000000e+00 : f32
    %115 = vector.broadcast %cst_36 : f32 to vector<8x128xf32>
    %116 = arith.subf %115, %114 : vector<8x128xf32>
    %cst_37 = arith.constant 0.000000e+00 : f32
    %117 = vector.broadcast %cst_37 : f32 to vector<8x128xf32>
    %118 = arith.maximumf %117, %116 : vector<8x128xf32>
    %119 = vector.extract_strided_slice %92 {offsets = [0, 0], sizes = [8, 1], strides = [1, 1]} : vector<8x8xf32> to vector<8x1xf32>
    %120 = vector.broadcast %119 : vector<8x1xf32> to vector<8x128xf32>
    %121 = arith.mulf %118, %120 : vector<8x128xf32>
    %122 = arith.addf %111, %121 : vector<8x128xf32>
    %cst_38 = arith.constant 1.000000e+00 : f32
    %123 = vector.broadcast %cst_38 : f32 to vector<8x128xf32>
    %124 = arith.subf %110, %123 : vector<8x128xf32>
    %125 = math.absf %124 : vector<8x128xf32>
    %cst_39 = arith.constant 1.000000e+00 : f32
    %126 = vector.broadcast %cst_39 : f32 to vector<8x128xf32>
    %127 = arith.subf %126, %125 : vector<8x128xf32>
    %cst_40 = arith.constant 0.000000e+00 : f32
    %128 = vector.broadcast %cst_40 : f32 to vector<8x128xf32>
    %129 = arith.maximumf %128, %127 : vector<8x128xf32>
    %130 = vector.extract_strided_slice %92 {offsets = [0, 1], sizes = [8, 1], strides = [1, 1]} : vector<8x8xf32> to vector<8x1xf32>
    %131 = vector.broadcast %130 : vector<8x1xf32> to vector<8x128xf32>
    %132 = arith.mulf %129, %131 : vector<8x128xf32>
    %133 = arith.addf %122, %132 : vector<8x128xf32>
    %cst_41 = arith.constant 2.000000e+00 : f32
    %134 = vector.broadcast %cst_41 : f32 to vector<8x128xf32>
    %135 = arith.subf %110, %134 : vector<8x128xf32>
    %136 = math.absf %135 : vector<8x128xf32>
    %cst_42 = arith.constant 1.000000e+00 : f32
    %137 = vector.broadcast %cst_42 : f32 to vector<8x128xf32>
    %138 = arith.subf %137, %136 : vector<8x128xf32>
    %cst_43 = arith.constant 0.000000e+00 : f32
    %139 = vector.broadcast %cst_43 : f32 to vector<8x128xf32>
    %140 = arith.maximumf %139, %138 : vector<8x128xf32>
    %141 = vector.extract_strided_slice %92 {offsets = [0, 2], sizes = [8, 1], strides = [1, 1]} : vector<8x8xf32> to vector<8x1xf32>
    %142 = vector.broadcast %141 : vector<8x1xf32> to vector<8x128xf32>
    %143 = arith.mulf %140, %142 : vector<8x128xf32>
    %144 = arith.addf %133, %143 : vector<8x128xf32>
    %cst_44 = arith.constant 3.000000e+00 : f32
    %145 = vector.broadcast %cst_44 : f32 to vector<8x128xf32>
    %146 = arith.subf %110, %145 : vector<8x128xf32>
    %147 = math.absf %146 : vector<8x128xf32>
    %cst_45 = arith.constant 1.000000e+00 : f32
    %148 = vector.broadcast %cst_45 : f32 to vector<8x128xf32>
    %149 = arith.subf %148, %147 : vector<8x128xf32>
    %cst_46 = arith.constant 0.000000e+00 : f32
    %150 = vector.broadcast %cst_46 : f32 to vector<8x128xf32>
    %151 = arith.maximumf %150, %149 : vector<8x128xf32>
    %152 = vector.extract_strided_slice %92 {offsets = [0, 3], sizes = [8, 1], strides = [1, 1]} : vector<8x8xf32> to vector<8x1xf32>
    %153 = vector.broadcast %152 : vector<8x1xf32> to vector<8x128xf32>
    %154 = arith.mulf %151, %153 : vector<8x128xf32>
    %155 = arith.addf %144, %154 : vector<8x128xf32>
    %cst_47 = arith.constant 4.000000e+00 : f32
    %156 = vector.broadcast %cst_47 : f32 to vector<8x128xf32>
    %157 = arith.subf %110, %156 : vector<8x128xf32>
    %158 = math.absf %157 : vector<8x128xf32>
    %cst_48 = arith.constant 1.000000e+00 : f32
    %159 = vector.broadcast %cst_48 : f32 to vector<8x128xf32>
    %160 = arith.subf %159, %158 : vector<8x128xf32>
    %cst_49 = arith.constant 0.000000e+00 : f32
    %161 = vector.broadcast %cst_49 : f32 to vector<8x128xf32>
    %162 = arith.maximumf %161, %160 : vector<8x128xf32>
    %163 = vector.extract_strided_slice %92 {offsets = [0, 4], sizes = [8, 1], strides = [1, 1]} : vector<8x8xf32> to vector<8x1xf32>
    %164 = vector.broadcast %163 : vector<8x1xf32> to vector<8x128xf32>
    %165 = arith.mulf %162, %164 : vector<8x128xf32>
    %166 = arith.addf %155, %165 : vector<8x128xf32>
    %167 = vector.extract_strided_slice %92 {offsets = [0, 5], sizes = [8, 1], strides = [1, 1]} : vector<8x8xf32> to vector<8x1xf32>
    %168 = vector.broadcast %167 : vector<8x1xf32> to vector<8x128xf32>
    %169 = arith.mulf %168, %109 : vector<8x128xf32>
    %170 = vector.extract_strided_slice %92 {offsets = [0, 6], sizes = [8, 1], strides = [1, 1]} : vector<8x8xf32> to vector<8x1xf32>
    %171 = vector.broadcast %170 : vector<8x1xf32> to vector<8x128xf32>
    %172 = arith.mulf %171, %166 : vector<8x128xf32>
    %173 = arith.addf %169, %172 : vector<8x128xf32>
    %174 = vector.extract_strided_slice %92 {offsets = [0, 7], sizes = [8, 1], strides = [1, 1]} : vector<8x8xf32> to vector<8x1xf32>
    %175 = vector.broadcast %174 : vector<8x1xf32> to vector<8x128xf32>
    %176 = arith.addf %173, %175 : vector<8x128xf32>
    %c0_50 = arith.constant 0 : index
    %c0_51 = arith.constant 0 : index
    %177 = vector.load %arg4[%c0_50, %c0_51] : memref<4x8xf32, #tpu.memory_space<vmem>>, vector<4x8xf32>
    %cst_52 = arith.constant 5.000000e-01 : f32
    %178 = vector.broadcast %cst_52 : f32 to vector<8x128xf32>
    %179 = arith.mulf %178, %176 : vector<8x128xf32>
    %180 = math.tanh %179 : vector<8x128xf32>
    %cst_53 = arith.constant 5.000000e-01 : f32
    %181 = vector.broadcast %cst_53 : f32 to vector<8x128xf32>
    %182 = arith.mulf %181, %180 : vector<8x128xf32>
    %cst_54 = arith.constant 5.000000e-01 : f32
    %183 = vector.broadcast %cst_54 : f32 to vector<8x128xf32>
    %184 = arith.addf %182, %183 : vector<8x128xf32>
    %185 = arith.mulf %176, %184 : vector<8x128xf32>
    %cst_55 = arith.constant -1.000000e+00 : f32
    %cst_56 = arith.constant 1.000000e+00 : f32
    %186 = vector.broadcast %cst_55 : f32 to vector<8x128xf32>
    %187 = arith.maximumf %186, %176 : vector<8x128xf32>
    %188 = vector.broadcast %cst_56 : f32 to vector<8x128xf32>
    %189 = arith.minimumf %188, %187 : vector<8x128xf32>
    %cst_57 = arith.constant -1.000000e+00 : f32
    %190 = vector.broadcast %cst_57 : f32 to vector<8x128xf32>
    %191 = arith.subf %189, %190 : vector<8x128xf32>
    %cst_58 = arith.constant 2.000000e+00 : f32
    %192 = vector.broadcast %cst_58 : f32 to vector<8x128xf32>
    %193 = arith.mulf %191, %192 : vector<8x128xf32>
    %194 = vector.extract_strided_slice %185 {offsets = [0, 0], sizes = [4, 128], strides = [1, 1]} : vector<8x128xf32> to vector<4x128xf32>
    %195 = vector.extract_strided_slice %193 {offsets = [0, 0], sizes = [4, 128], strides = [1, 1]} : vector<8x128xf32> to vector<4x128xf32>
    %cst_59 = arith.constant 0.000000e+00 : f32
    %196 = vector.broadcast %cst_59 : f32 to vector<4x128xf32>
    %cst_60 = arith.constant 0.000000e+00 : f32
    %197 = vector.broadcast %cst_60 : f32 to vector<4x128xf32>
    %198 = arith.subf %195, %197 : vector<4x128xf32>
    %199 = math.absf %198 : vector<4x128xf32>
    %cst_61 = arith.constant 1.000000e+00 : f32
    %200 = vector.broadcast %cst_61 : f32 to vector<4x128xf32>
    %201 = arith.subf %200, %199 : vector<4x128xf32>
    %cst_62 = arith.constant 0.000000e+00 : f32
    %202 = vector.broadcast %cst_62 : f32 to vector<4x128xf32>
    %203 = arith.maximumf %202, %201 : vector<4x128xf32>
    %204 = vector.extract_strided_slice %177 {offsets = [0, 0], sizes = [4, 1], strides = [1, 1]} : vector<4x8xf32> to vector<4x1xf32>
    %205 = vector.broadcast %204 : vector<4x1xf32> to vector<4x128xf32>
    %206 = arith.mulf %203, %205 : vector<4x128xf32>
    %207 = arith.addf %196, %206 : vector<4x128xf32>
    %cst_63 = arith.constant 1.000000e+00 : f32
    %208 = vector.broadcast %cst_63 : f32 to vector<4x128xf32>
    %209 = arith.subf %195, %208 : vector<4x128xf32>
    %210 = math.absf %209 : vector<4x128xf32>
    %cst_64 = arith.constant 1.000000e+00 : f32
    %211 = vector.broadcast %cst_64 : f32 to vector<4x128xf32>
    %212 = arith.subf %211, %210 : vector<4x128xf32>
    %cst_65 = arith.constant 0.000000e+00 : f32
    %213 = vector.broadcast %cst_65 : f32 to vector<4x128xf32>
    %214 = arith.maximumf %213, %212 : vector<4x128xf32>
    %215 = vector.extract_strided_slice %177 {offsets = [0, 1], sizes = [4, 1], strides = [1, 1]} : vector<4x8xf32> to vector<4x1xf32>
    %216 = vector.broadcast %215 : vector<4x1xf32> to vector<4x128xf32>
    %217 = arith.mulf %214, %216 : vector<4x128xf32>
    %218 = arith.addf %207, %217 : vector<4x128xf32>
    %cst_66 = arith.constant 2.000000e+00 : f32
    %219 = vector.broadcast %cst_66 : f32 to vector<4x128xf32>
    %220 = arith.subf %195, %219 : vector<4x128xf32>
    %221 = math.absf %220 : vector<4x128xf32>
    %cst_67 = arith.constant 1.000000e+00 : f32
    %222 = vector.broadcast %cst_67 : f32 to vector<4x128xf32>
    %223 = arith.subf %222, %221 : vector<4x128xf32>
    %cst_68 = arith.constant 0.000000e+00 : f32
    %224 = vector.broadcast %cst_68 : f32 to vector<4x128xf32>
    %225 = arith.maximumf %224, %223 : vector<4x128xf32>
    %226 = vector.extract_strided_slice %177 {offsets = [0, 2], sizes = [4, 1], strides = [1, 1]} : vector<4x8xf32> to vector<4x1xf32>
    %227 = vector.broadcast %226 : vector<4x1xf32> to vector<4x128xf32>
    %228 = arith.mulf %225, %227 : vector<4x128xf32>
    %229 = arith.addf %218, %228 : vector<4x128xf32>
    %cst_69 = arith.constant 3.000000e+00 : f32
    %230 = vector.broadcast %cst_69 : f32 to vector<4x128xf32>
    %231 = arith.subf %195, %230 : vector<4x128xf32>
    %232 = math.absf %231 : vector<4x128xf32>
    %cst_70 = arith.constant 1.000000e+00 : f32
    %233 = vector.broadcast %cst_70 : f32 to vector<4x128xf32>
    %234 = arith.subf %233, %232 : vector<4x128xf32>
    %cst_71 = arith.constant 0.000000e+00 : f32
    %235 = vector.broadcast %cst_71 : f32 to vector<4x128xf32>
    %236 = arith.maximumf %235, %234 : vector<4x128xf32>
    %237 = vector.extract_strided_slice %177 {offsets = [0, 3], sizes = [4, 1], strides = [1, 1]} : vector<4x8xf32> to vector<4x1xf32>
    %238 = vector.broadcast %237 : vector<4x1xf32> to vector<4x128xf32>
    %239 = arith.mulf %236, %238 : vector<4x128xf32>
    %240 = arith.addf %229, %239 : vector<4x128xf32>
    %cst_72 = arith.constant 4.000000e+00 : f32
    %241 = vector.broadcast %cst_72 : f32 to vector<4x128xf32>
    %242 = arith.subf %195, %241 : vector<4x128xf32>
    %243 = math.absf %242 : vector<4x128xf32>
    %cst_73 = arith.constant 1.000000e+00 : f32
    %244 = vector.broadcast %cst_73 : f32 to vector<4x128xf32>
    %245 = arith.subf %244, %243 : vector<4x128xf32>
    %cst_74 = arith.constant 0.000000e+00 : f32
    %246 = vector.broadcast %cst_74 : f32 to vector<4x128xf32>
    %247 = arith.maximumf %246, %245 : vector<4x128xf32>
    %248 = vector.extract_strided_slice %177 {offsets = [0, 4], sizes = [4, 1], strides = [1, 1]} : vector<4x8xf32> to vector<4x1xf32>
    %249 = vector.broadcast %248 : vector<4x1xf32> to vector<4x128xf32>
    %250 = arith.mulf %247, %249 : vector<4x128xf32>
    %251 = arith.addf %240, %250 : vector<4x128xf32>
    %252 = vector.extract_strided_slice %177 {offsets = [0, 5], sizes = [4, 1], strides = [1, 1]} : vector<4x8xf32> to vector<4x1xf32>
    %253 = vector.broadcast %252 : vector<4x1xf32> to vector<4x128xf32>
    %254 = arith.mulf %253, %194 : vector<4x128xf32>
    %255 = vector.extract_strided_slice %177 {offsets = [0, 6], sizes = [4, 1], strides = [1, 1]} : vector<4x8xf32> to vector<4x1xf32>
    %256 = vector.broadcast %255 : vector<4x1xf32> to vector<4x128xf32>
    %257 = arith.mulf %256, %251 : vector<4x128xf32>
    %258 = arith.addf %254, %257 : vector<4x128xf32>
    %259 = vector.extract_strided_slice %177 {offsets = [0, 7], sizes = [4, 1], strides = [1, 1]} : vector<4x8xf32> to vector<4x1xf32>
    %260 = vector.broadcast %259 : vector<4x1xf32> to vector<4x128xf32>
    %261 = arith.addf %258, %260 : vector<4x128xf32>
    %c0_75 = arith.constant 0 : index
    %c0_76 = arith.constant 0 : index
    %262 = vector.load %arg5[%c0_75, %c0_76] : memref<4x128xf32, #tpu.memory_space<vmem>>, vector<4x128xf32>
    tpu.vector_store %arg5[%c0_75, %c0_76], %261 {strides = array<i32>} : memref<4x128xf32, #tpu.memory_space<vmem>>, vector<4x128xf32>,
    return
  }
  func.func @transform_0(%arg0: i32) -> (i32, i32) {
    %c0_i32 = arith.constant 0 : i32
    %c0_i32_0 = arith.constant 0 : i32
    return %c0_i32, %arg0 : i32, i32
  }
  func.func @transform_1(%arg0: i32) -> (i32, i32) {
    %c0_i32 = arith.constant 0 : i32
    %c0_i32_0 = arith.constant 0 : i32
    %c0_i32_1 = arith.constant 0 : i32
    return %c0_i32, %c0_i32_0 : i32, i32
  }
  func.func @transform_2(%arg0: i32) -> (i32, i32) {
    %c0_i32 = arith.constant 0 : i32
    %c0_i32_0 = arith.constant 0 : i32
    %c0_i32_1 = arith.constant 0 : i32
    return %c0_i32, %c0_i32_0 : i32, i32
  }
  func.func @transform_3(%arg0: i32) -> (i32, i32) {
    %c0_i32 = arith.constant 0 : i32
    %c0_i32_0 = arith.constant 0 : i32
    %c0_i32_1 = arith.constant 0 : i32
    return %c0_i32, %c0_i32_0 : i32, i32
  }
  func.func @transform_4(%arg0: i32) -> (i32, i32) {
    %c0_i32 = arith.constant 0 : i32
    %c0_i32_0 = arith.constant 0 : i32
    return %c0_i32, %arg0 : i32, i32
  }
}

</mosaic_0001>

<bundles_post_ra>
// kernel: kan_forward.1
= control target key start
LH: loop header
LB: loop body
LE: loop exit
PB: predicated region body
PF: predicated region fallthrough
CT: control target
= control target key end

     0   :  { %9 = vsyncpa [#allocation3], 0  ;;  %s906_s0 = inlined_call_operand.vmem [shape: f32[4,256], index: 0, kind: input, shape index: {}]   ;;  %s907_s1 = inlined_call_operand.vmem [shape: f32[16,8], index: 1, kind: input, shape index: {}]   ;;  %s908_s2 = inlined_call_operand.vmem [shape: f32[8,8], index: 2, kind: input, shape index: {}]   ;;  %s909_s3 = inlined_call_operand.vmem [shape: f32[4,8], index: 3, kind: input, shape index: {}]   ;;  %s910_s4 = inlined_call_operand.hbm [shape: f32[4,256], index: 4, kind: output, shape index: {}]  }
   0x1   :  { %11 = vsyncpa [#allocation3 + $0x1], 0  ;;  %s810_s15 = smov 0   ;;  %s812_s16 = smov 0  }
   0x2   :  { %s814_s17 = smov 0   ;;  %s816_s18 = smov 0  }
   0x3 LB: > { %s831_s19 = sadd.s32 4294967295, %s772_s18   ;;  %s605_s20 = sadd.s32 4294967294, %s772_s18   ;;  %s772_s18 = sphi %s816_s18, %s916_s18   ;;  %s768_s17 = sphi %s814_s17, %s915_s17   ;;  %s764_s16 = sphi %s812_s16, %s914_s16   ;;  %s760_s15 = sphi %s810_s15, %s913_s15  }
   0x4   : > { %s835_s21 = sadd.s32 1, %s772_s18   ;;  %s113_s22 = sadd.s32 1, %s768_s17 }
   0x5   : > { %s110_s23 = ssub.s32 %s772_s18, %s835_s21  ;;  %p123_p0 = scmp.ne.s32.totalorder %s768_s17, %s764_s16 }
   0x6   : > { %p111_p1 = scmp.eq.s32.totalorder %s110_s23, 0  ;;  %p124_p2 = scmp.eq.s32.totalorder %s831_s19, 1 }
   0x7   : > { %p129_p3 = scmp.ne.s32.totalorder %s764_s16, %s760_s15  ;;  %p130_p4 = scmp.eq.s32.totalorder %s605_s20, 1 }
   0x8   : > { %s846_s24 = scalar_select %p111_p1, %s768_s17, %s113_s22  }
   0x9   : > { %p848_p5 = por %p124_p2, %p123_p0  ;;  %p852_p6 = por %p130_p4, %p129_p3 }
   0xa   : > { %p608_p7 = scmp.ge.s32.totalorder %s772_s18, 1  ;;  %p164_p8 = scmp.lt.s32.totalorder %s772_s18, 3 }
   0xc   : > { %p165_p9 = pnand %p608_p7, %p164_p8 }
   0xd   : > { %p189_p10 = scmp.lt.s32.totalorder (!%p165_p9), %s831_s19, 1  ;;  %s186_s12 = sand.u32 (!%p165_p9), 1, %s764_s16  }
   0xe   : > { %168 = sbr.rel (%p165_p9) target bundleno = 243 (0xf3), region = 36  ;;  %s609_s13 = sshll.u32 (!%p165_p9), %s186_s12, 2 }
   0xf   : > { %s630_s14 = sshll.u32 (!%p165_p9), %s831_s19, 6  ;;  %s188_s20 = scalar_lea.vmem (!%p165_p9), [#allocation2], %s609_s13 }
  0x10   : > { %s546_s22 = sshll.u32 (!%p165_p9), %s188_s20, 4  ;;  %s544_s28 = scalar_lea.hbm (!%p165_p9), %s910_s4, %s630_s14  ;;  %s547_s22 = int_to_ptr.vmem [resolvable:$true] %s546_s22 }
  0x11   : > { %s533_s29 = scalar_lea.sflag (!%p165_p9), [#allocation3], %s186_s12  ;;  %s712_s30 = scalar_lea.vmem (!%p165_p9), %s547_s22, 64 }
  0x12   : > { %p713_p11 = scmp.ne.s32.totalorder (!%p165_p9), %s547_s22, %s712_s30  ;;  %s784_s5 = smov (!%p165_p9), [#allocation2]  }
  0x13   : > { %v194_v0 = vld [vmem:[%s907_s1] sm:$0xff]  ;;  %v774_v1 = vmov 0   ;;  %v775_v2 = vmov 2   ;;  %v776_v3 = vmov 1   ;;  %v777_v4 = vmov 3   ;;  %s190_s7 = scalar_select %p189_p10, %s831_s19, 1 }
  0x14   : > { %682 = vset.pattern.permute.xlu0 %v774_v1  ;;  %684 = vset.pattern.permute.xlu1 %v775_v2  ;;  %v778_v5 = vmov 4   ;;  %v779_v6 = vmov 5   ;;  %v780_v7 = vmov 6   ;;  %v379_v8 = vld [vmem:[%s908_s2] sm:$0xff]  ;;  %v781_v9 = vmov 7   ;;  %p714_p12 = pnand %p713_p11, %p848_p5  ;;  %s716_s6 = sshll.u32 %s784_s5, 4  ;;  %s717_s6 = int_to_ptr.vmem [resolvable:$false] %s716_s6 }
  0x15   : > { %210 = vperm.xlu0 %682, %v194_v0   ;;  %271 = vperm.xlu1 %684, %v194_v0   ;;  %v455_v10 = vld [vmem:[%s909_s3] sm:$0xf]  ;;  %s610_s8 = sshll.u32 %s190_s7, 2  ;;  %v219_v16 = vlaneseq  ;;  %v782_v17 = vmov 839922192   ;;  %s718_s19 = scalar_lea.vmem %s717_s6, 128 }
  0x16   : > { %s192_s11 = scalar_lea.vmem %s906_s0, %s610_s8  ;;  %v217_v18 = vunpack.c.l.s4 %v782_v17  ;;  %v783_v19 = vmov 1985246804   ;;  %p715_p13 = pneg %p714_p12 }
  0x17   : > { %v193_v11 = vld [vmem:[%s192_s11] sm:$0xf]  ;;  %v224_v20 = vunpack.c.l.s4 %v783_v19  ;;  %v220_v23 = vshrl.u32 %v219_v16, 7  ;;  %p719_p0 = scmp.lt.s32.totalorder %s547_s22, %s717_s6  ;;  %p720_p1 = scmp.lt.s32.totalorder %s718_s19, %s712_s30 }
  0x18   : > { %v611_v12 = vclamps-f32 %v193_v11, 1.0  ;;  %v196_v13 = vmul.f32 0.5, %v193_v11  ;;  %v218_v24 = vunpack.c.0.s8 %v217_v18 }
  0x19   : > { %683 = vset.pattern.permute.xlu0 %v776_v3  ;;  %685 = vset.pattern.permute.xlu1 %v777_v4  ;;  %v225_v25 = vunpack.c.0.s8 %v224_v20  ;;  %p721_p2 = por %p720_p1, %p719_p0 }
  0x1a   : > { %241 = vperm.xlu0 %683, %v194_v0   ;;  %301 = vperm.xlu1 %685, %v194_v0   ;;  %v612_v14 = vadd.f32 1.0, %v611_v12  ;;  %706 = vtanh.f32 %v196_v13  ;;  %v221_v32 = vsub.s32 %v218_v24, %v220_v23 }
  0x1b   : > { %v228_v33 = vsub.s32 %v225_v25, %v220_v23  ;;  %p722_p3 = pnand %p721_p2, %p715_p13 }
  0x1c   : > { %v204_v15 = vmul.f32 2.0, %v612_v14 }
  0x1e   : > { %686 = vset.pattern.permute.xlu1 %v778_v5  ;;  %687 = vset.pattern.permute.xlu0 %v779_v6  ;;  %v613_v21 = vadd.f32 -1.0, %v204_v15  ;;  %v614_v22 = vadd.f32 -2.0, %v204_v15  ;;  %v205_v26 = vand.u32 2147483647, %v204_v15  ;;  %v615_v27 = vadd.f32 -3.0, %v204_v15 }
  0x1f   : > { %331 = vperm.xlu1 %686, %v194_v0   ;;  %357 = vperm.xlu0 %687, %v194_v0   ;;  %v616_v30 = vadd.f32 -4.0, %v204_v15 }
  0x20   : > { %v237_v28 = vand.u32 2147483647, %v613_v21  ;;  %v267_v29 = vand.u32 2147483647, %v614_v22  ;;  %v206_v34 = vsub.f32 1.0, %v205_v26 }
  0x21   : > { %v297_v35 = vand.u32 2147483647, %v615_v27  ;;  %v327_v40 = vand.u32 2147483647, %v616_v30 }
  0x22   : > { %v238_v38 = vsub.f32 1.0, %v237_v28  ;;  %v268_v39 = vsub.f32 1.0, %v267_v29  ;;  %v207_v42 = vmax.f32 %v206_v34, 0.0 }
  0x23   : > { %688 = vset.pattern.permute.xlu1 %v780_v7  ;;  %690 = vset.pattern.permute.xlu0 %v774_v1  ;;  %v298_v45 = vsub.f32 1.0, %v297_v35  ;;  %v328_v50 = vsub.f32 1.0, %v327_v40 }
  0x24   : > { %365 = vperm.xlu1 %688, %v194_v0   ;;  %394 = vperm.xlu0 %690, %v379_v8   ;;  %v239_v46 = vmax.f32 %v238_v38, 0.0  ;;  %v269_v47 = vmax.f32 %v268_v39, 0.0 }
  0x25   : > { %v299_v58 = vmax.f32 %v298_v45, 0.0  ;;  %v329_v63 = vmax.f32 %v328_v50, 0.0 }
  0x27   : > { %v707_v31 = vpop.eup %706 }
  0x28   : > { %689 = vset.pattern.permute.xlu1 %v781_v9  ;;  %693 = vset.pattern.permute.xlu0 %v777_v4  ;;  %v198_v41 = vmul.f32 0.5, %v707_v31 }
  0x29   : > { %375 = vperm.xlu1 %689, %v194_v0   ;;  %424 = vperm.xlu0 %693, %v379_v8  }
  0x2a   : > { %v199_v51 = vadd.f32 0.5, %v198_v41 }
  0x2c   : > { %v200_v0 = vmul.f32 %v199_v51, %v193_v11 }
  0x2d   : > { %691 = vset.pattern.permute.xlu1 %v776_v3  ;;  %696 = vset.pattern.permute.xlu0 %v780_v7 }
  0x2e   : > { %404 = vperm.xlu1 %691, %v379_v8   ;;  %445 = vperm.xlu0 %696, %v379_v8   ;;  %v361_v17 = vcombine.low %v200_v0, %v200_v0 }
  0x32   : > { %692 = vset.pattern.permute.xlu1 %v775_v2  ;;  %699 = vset.pattern.permute.xlu0 %v776_v3 }
  0x33   : > { %414 = vperm.xlu1 %692, %v379_v8   ;;  %480 = vperm.xlu0 %699, %v455_v10  }
  0x37   : > { %694 = vset.pattern.permute.xlu1 %v778_v5  ;;  %702 = vset.pattern.permute.xlu0 %v778_v5 }
  0x38   : > { %434 = vperm.xlu1 %694, %v379_v8   ;;  %510 = vperm.xlu0 %702, %v455_v10  }
  0x3c   : > { %695 = vset.pattern.permute.xlu1 %v779_v6  ;;  %705 = vset.pattern.permute.xlu0 %v781_v9 }
  0x3d   : > { %440 = vperm.xlu1 %695, %v379_v8   ;;  %527 = vperm.xlu0 %705, %v455_v10  }
  0x41   : > { %697 = vset.pattern.permute.xlu1 %v781_v9 }
  0x42   : > { %451 = vperm.xlu1 %697, %v379_v8  }
  0x46   : > { %698 = vset.pattern.permute.xlu1 %v774_v1 }
  0x47   : > { %470 = vperm.xlu1 %698, %v455_v10  }
  0x4b   : > { %700 = vset.pattern.permute.xlu1 %v775_v2 }
  0x4c   : > { %490 = vperm.xlu1 %700, %v455_v10  }
  0x50   : > { %701 = vset.pattern.permute.xlu1 %v777_v4 }
  0x51   : > { %500 = vperm.xlu1 %701, %v455_v10  }
  0x55   : > { %703 = vset.pattern.permute.xlu1 %v779_v6 }
  0x56   : > { %516 = vperm.xlu1 %703, %v455_v10  }
  0x5a   : > { %704 = vset.pattern.permute.xlu1 %v780_v7 }
  0x5b   : > { %521 = vperm.xlu1 %704, %v455_v10  }
  0x90   : > { %v211_v36 = vpop.permute.xlu0 %210  ;;  %v272_v37 = vpop.permute.xlu1 %271 }
  0x91   : > { %v222_v43 = vrot.slane %v211_v36, %v221_v32  ;;  %v229_v44 = vrot.slane %v211_v36, %v228_v33  ;;  %v282_v52 = vrot.slane %v272_v37, %v221_v32  ;;  %v289_v53 = vrot.slane %v272_v37, %v228_v33 }
  0x93   : > { %v232_v56 = vmul.f32 %v222_v43, %v207_v42  ;;  %v233_v57 = vmul.f32 %v229_v44, %v207_v42  ;;  %v292_v1 = vmul.f32 %v282_v52, %v269_v47  ;;  %v293_v2 = vmul.f32 %v289_v53, %v269_v47 }
  0x95   : > { %v242_v48 = vpop.permute.xlu0 %241  ;;  %v302_v49 = vpop.permute.xlu1 %301 }
  0x96   : > { %v252_v54 = vrot.slane %v242_v48, %v221_v32  ;;  %v259_v55 = vrot.slane %v242_v48, %v228_v33  ;;  %v312_v61 = vrot.slane %v302_v49, %v221_v32  ;;  %v319_v62 = vrot.slane %v302_v49, %v228_v33 }
  0x98   : > { %v262_v59 = vmul.f32 %v252_v54, %v239_v46  ;;  %v263_v60 = vmul.f32 %v259_v55, %v239_v46  ;;  %v322_v10 = vmul.f32 %v312_v61, %v299_v58  ;;  %v323_v12 = vmul.f32 %v319_v62, %v299_v58 }
  0x9a   : > { %v264_v3 = vadd.f32 %v262_v59, %v232_v56  ;;  %v265_v4 = vadd.f32 %v263_v60, %v233_v57  ;;  %v332_v5 = vpop.permute.xlu1 %331  ;;  %v358_v19 = vpop.permute.xlu0 %357 }
  0x9b   : > { %v342_v6 = vrot.slane %v332_v5, %v221_v32  ;;  %v349_v7 = vrot.slane %v332_v5, %v228_v33  ;;  %v363_v22 = vmul.f32 %v361_v17, %v358_v19 }
  0x9c   : > { %v294_v8 = vadd.f32 %v292_v1, %v264_v3  ;;  %v295_v9 = vadd.f32 %v293_v2, %v265_v4 }
  0x9d   : > { %v352_v13 = vmul.f32 %v342_v6, %v329_v63  ;;  %v353_v14 = vmul.f32 %v349_v7, %v329_v63 }
  0x9e   : > { %v324_v15 = vadd.f32 %v322_v10, %v294_v8  ;;  %v325_v16 = vadd.f32 %v323_v12, %v295_v9 }
  0x9f   : > { %v366_v18 = vpop.permute.xlu1 %365  ;;  %v395_v41 = vpop.permute.xlu0 %394 }
  0xa0   : > { %v354_v20 = vadd.f32 %v352_v13, %v324_v15  ;;  %v355_v11 = vadd.f32 %v353_v14, %v325_v16 }
  0xa2   : > { %v370_v21 = vcombine.low %v354_v20, %v355_v11 }
  0xa4   : > { %v372_v23 = vmul.f32 %v370_v21, %v366_v18  ;;  %v376_v24 = vpop.permute.xlu1 %375  ;;  %v425_v56 = vpop.permute.xlu0 %424 }
  0xa6   : > { %v373_v25 = vadd.f32 %v372_v23, %v363_v22 }
  0xa8   : > { %v378_v26 = vadd.f32 %v376_v24, %v373_v25 }
  0xa9   : > { %v405_v30 = vpop.permute.xlu1 %404  ;;  %v446_v4 = vpop.permute.xlu0 %445 }
  0xaa   : > { %v380_v27 = vmul.f32 0.5, %v378_v26  ;;  %v617_v28 = vclamps-f32 %v378_v26, 1.0 }
  0xac   : > { %708 = vtanh.f32 %v380_v27  ;;  %v618_v29 = vadd.f32 1.0, %v617_v28 }
  0xae   : > { %v388_v31 = vmul.f32 2.0, %v618_v29  ;;  %v415_v40 = vpop.permute.xlu1 %414 }
  0xb0   : > { %v619_v32 = vadd.f32 -1.0, %v388_v31  ;;  %v620_v33 = vadd.f32 -2.0, %v388_v31  ;;  %v389_v34 = vand.u32 2147483647, %v388_v31  ;;  %v622_v35 = vadd.f32 -4.0, %v388_v31 }
  0xb1   : > { %v621_v36 = vadd.f32 -3.0, %v388_v31  ;;  %v481_v31 = vpop.permute.xlu0 %480 }
  0xb2   : > { %v400_v37 = vand.u32 2147483647, %v619_v32  ;;  %v410_v38 = vand.u32 2147483647, %v620_v33  ;;  %v390_v39 = vsub.f32 1.0, %v389_v34 }
  0xb3   : > { %v430_v42 = vand.u32 2147483647, %v622_v35  ;;  %v420_v43 = vand.u32 2147483647, %v621_v36  ;;  %v435_v55 = vpop.permute.xlu1 %434 }
  0xb4   : > { %v401_v44 = vsub.f32 1.0, %v400_v37  ;;  %v411_v45 = vsub.f32 1.0, %v410_v38  ;;  %v391_v46 = vmax.f32 %v390_v39, 0.0 }
  0xb5   : > { %v421_v47 = vsub.f32 1.0, %v420_v43  ;;  %v431_v50 = vsub.f32 1.0, %v430_v42 }
  0xb6   : > { %v402_v48 = vmax.f32 %v401_v44, 0.0  ;;  %v412_v49 = vmax.f32 %v411_v45, 0.0  ;;  %v397_v52 = vmul.f32 %v395_v41, %v391_v46  ;;  %v511_v45 = vpop.permute.xlu0 %510 }
  0xb7   : > { %v422_v53 = vmax.f32 %v421_v47, 0.0  ;;  %v432_v59 = vmax.f32 %v431_v50, 0.0 }
  0xb8   : > { %v407_v51 = vmul.f32 %v405_v30, %v402_v48  ;;  %v417_v57 = vmul.f32 %v415_v40, %v412_v49  ;;  %v441_v0 = vpop.permute.xlu1 %440 }
  0xb9   : > { %v709_v54 = vpop.eup %708  ;;  %v427_v62 = vmul.f32 %v425_v56, %v422_v53  ;;  %v437_v1 = vmul.f32 %v435_v55, %v432_v59 }
  0xba   : > { %v408_v58 = vadd.f32 %v407_v51, %v397_v52  ;;  %v382_v60 = vmul.f32 0.5, %v709_v54  ;;  %v528_v56 = vpop.permute.xlu0 %527 }
  0xbc   : > { %v418_v61 = vadd.f32 %v417_v57, %v408_v58  ;;  %v383_v63 = vadd.f32 0.5, %v382_v60 }
  0xbd   : > { %v452_v6 = vpop.permute.xlu1 %451 }
  0xbe   : > { %v428_v2 = vadd.f32 %v427_v62, %v418_v61  ;;  %v384_v3 = vmul.f32 %v383_v63, %v378_v26 }
  0xc0   : > { %v438_v5 = vadd.f32 %v437_v1, %v428_v2  ;;  %v443_v7 = vmul.f32 %v441_v0, %v384_v3 }
  0xc2   : > { %v448_v8 = vmul.f32 %v446_v4, %v438_v5  ;;  %v471_v10 = vpop.permute.xlu1 %470 }
  0xc4   : > { %v449_v9 = vadd.f32 %v448_v8, %v443_v7 }
  0xc6   : > { %v454_v12 = vadd.f32 %v452_v6, %v449_v9 }
  0xc7   : > { %v491_v16 = vpop.permute.xlu1 %490 }
  0xc8   : > { %v456_v13 = vmul.f32 0.5, %v454_v12  ;;  %v623_v14 = vclamps-f32 %v454_v12, 1.0 }
  0xca   : > { %710 = vtanh.f32 %v456_v13  ;;  %v624_v15 = vadd.f32 1.0, %v623_v14 }
  0xcc   : > { %v464_v17 = vmul.f32 2.0, %v624_v15  ;;  %v501_v25 = vpop.permute.xlu1 %500 }
  0xce   : > { %v465_v18 = vand.u32 2147483647, %v464_v17  ;;  %v626_v19 = vadd.f32 -2.0, %v464_v17  ;;  %v625_v20 = vadd.f32 -1.0, %v464_v17  ;;  %v627_v11 = vadd.f32 -3.0, %v464_v17 }
  0xcf   : > { %v628_v21 = vadd.f32 -4.0, %v464_v17 }
  0xd0   : > { %v466_v22 = vsub.f32 1.0, %v465_v18  ;;  %v486_v23 = vand.u32 2147483647, %v626_v19  ;;  %v476_v24 = vand.u32 2147483647, %v625_v20 }
  0xd1   : > { %v496_v26 = vand.u32 2147483647, %v627_v11  ;;  %v506_v27 = vand.u32 2147483647, %v628_v21  ;;  %v517_v40 = vpop.permute.xlu1 %516 }
  0xd2   : > { %v467_v28 = vmax.f32 %v466_v22, 0.0  ;;  %v487_v29 = vsub.f32 1.0, %v486_v23  ;;  %v477_v30 = vsub.f32 1.0, %v476_v24 }
  0xd3   : > { %v497_v32 = vsub.f32 1.0, %v496_v26  ;;  %v507_v35 = vsub.f32 1.0, %v506_v27 }
  0xd4   : > { %v488_v33 = vmax.f32 %v487_v29, 0.0  ;;  %v478_v34 = vmax.f32 %v477_v30, 0.0  ;;  %v473_v36 = vmul.f32 %v471_v10, %v467_v28 }
  0xd5   : > { %v498_v38 = vmax.f32 %v497_v32, 0.0  ;;  %v508_v43 = vmax.f32 %v507_v35, 0.0 }
  0xd6   : > { %v483_v37 = vmul.f32 %v481_v31, %v478_v34  ;;  %v493_v41 = vmul.f32 %v491_v16, %v488_v33  ;;  %v522_v52 = vpop.permute.xlu1 %521 }
  0xd7   : > { %v711_v39 = vpop.eup %710  ;;  %v503_v47 = vmul.f32 %v501_v25, %v498_v38  ;;  %v513_v50 = vmul.f32 %v511_v45, %v508_v43 }
  0xd8   : > { %v484_v42 = vadd.f32 %v483_v37, %v473_v36  ;;  %v458_v44 = vmul.f32 0.5, %v711_v39 }
  0xda   : > { %v494_v46 = vadd.f32 %v493_v41, %v484_v42  ;;  %v459_v48 = vadd.f32 0.5, %v458_v44 }
  0xdc   : > { %v504_v49 = vadd.f32 %v503_v47, %v494_v46  ;;  %v460_v51 = vmul.f32 %v459_v48, %v454_v12 }
  0xde   : > { %v514_v53 = vadd.f32 %v513_v50, %v504_v49  ;;  %v519_v54 = vmul.f32 %v517_v40, %v460_v51 }
  0xe0   : > { %v524_v55 = vmul.f32 %v522_v52, %v514_v53 }
  0xe2   : > { %v525_v57 = vadd.f32 %v524_v55, %v519_v54 }
  0xe4   : > { %v530_v58 = vadd.f32 %v528_v56, %v525_v57 }
  0xe6   : > { %531 = vst [vmem:[%s188_s20] sm:$0xf] %v530_v58 }
  0xe7   : > { %725 = shalt.err (!%p722_p3)
}
  0xe8   : > { %s726_s7 = scalar_lea.hbm %s544_s28, 64  ;;  %s730_s10 = scalar_lea.hbm %s910_s4, 128 }
  0xe9   : > { %p727_p4 = scmp.ne.s32.totalorder %s544_s28, %s726_s7  ;;  %p731_p9 = scmp.lt.s32.totalorder %s544_s28, %s910_s4 }
  0xea   : > { %p732_p10 = scmp.lt.s32.totalorder %s730_s10, %s726_s7 }
  0xeb   : > { %p728_p7 = pnand %p727_p4, %p848_p5 }
  0xec   : > { %p733_p11 = por %p732_p10, %p731_p9 }
  0xed   : > { %p729_p8 = pneg %p728_p7 }
  0xef   : > { %p734_p12 = pnand %p733_p11, %p729_p8 }
  0xf1   : > { %737 = shalt.err (!%p734_p12)
}
  0xf2   : > { %633 = dma.vmem_to_hbm [thread:$0]  (%p848_p5), %s547_s22, 64, %s544_s28, %s533_s29  }
  0xf3 PF: > { %p639_p13 = scmp.ge.s32.totalorder %s772_s18, 2  ;;  %s558_s13 = sand.u32 1, %s760_s15  }
  0xf4   : > { %s559_s14 = scalar_lea.sflag [#allocation3], %s558_s13 }
  0xf5   : > { %p636_p0 = pnand %p639_p13, %p852_p6 }
  0xf7   : > { %p637_p1 = pneg %p636_p0 }
  0xf9   : > { %755 = dma.done.wait (%p637_p1), %s559_s14, 64  }
  0xfa   : > { %757 = vsyncadd (%p637_p1), %s559_s14, 4294967232  ;;  %p14_p2 = scmp.ge.s32.totalorder %s835_s21, 4   ;;  %s913_s15 = smov %s764_s16 }
  0xfb   : > { %s914_s16 = smov %s768_s17  ;;  %s915_s17 = smov %s846_s24 }
  0xfc   : > { %s916_s18 = smov %s835_s21  ;;  %16 = sbr.rel (!%p14_p2) target bundleno = 3 (0x3), region = 71 }
 0x101   :  { %564 = vsyncpa [#allocation3], 1 }
 0x102   :  { %566 = vsyncpa [#allocation3 + $0x1], 1 }

</bundles_post_ra>
